<compile_context>
chip_gen: v5e
topology: v5e:2x2
jax: 0.10.0
libtpu: 0.0.40
codegen_flags: <defaults>
</compile_context>

<pallas_src>
import functools

import jax
import jax.numpy as jnp
from jax.experimental import pallas as pl
from jax.experimental.pallas import tpu as pltpu


# ---------------------------------------------------------------------------
# Kernel
# ---------------------------------------------------------------------------
def _mlp_kernel(x_ref,
                w1_ref, b1_ref,
                w2_ref, b2_ref,
                w3_ref, b3_ref,
                w4_ref, b4_ref,
                w5_ref, b5_ref,
                out_ref):
    """Fused 5-layer MLP on one (features, TILE_M) column tile.

    Feature-major: lane axis = batch tile (multiple of 128) -> unmasked,
    lane-dense stores and full-lane VPU work.  Weights are (out, in) bf16,
    MXU accumulates in f32, activations/bias/ReLU stay in f32, and the final
    store is bf16 to halve output write traffic.
    """

    def layer(w_ref, b_ref, h_f32, relu):
        y = jnp.dot(w_ref[...], h_f32.astype(jnp.bfloat16),
                    preferred_element_type=jnp.float32)
        y = y + b_ref[...]                # (out, 1) broadcasts along lanes
        if relu:
            y = jnp.maximum(y, 0.0)
        return y

    # IL + ReLU (x tile already bf16 -> feed the MXU directly)
    h = jnp.dot(w1_ref[...], x_ref[...],
                preferred_element_type=jnp.float32) + b1_ref[...]
    h = jnp.maximum(h, 0.0)
    h = layer(w2_ref, b2_ref, h, relu=True)    # HL2 + ReLU
    h = layer(w3_ref, b3_ref, h, relu=True)    # HL3 + ReLU
    h = layer(w4_ref, b4_ref, h, relu=True)    # HL4 + ReLU
    h = layer(w5_ref, b5_ref, h, relu=False)   # FL (unused Softmax omitted)

    out_ref[...] = h.astype(out_ref.dtype)


# ---------------------------------------------------------------------------
# Tiling / dispatch helpers
# ---------------------------------------------------------------------------
TILE_M_DEFAULT = 8192        # sweep 8192-16384 for very large batches
_TILE_M_MAX = 16384          # keeps VMEM use < v5e's 16 MiB scoped default
_XLA_FALLBACK_ROWS = 4096    # below this, plain XLA beats any pallas_call


def _round_up(n, m):
    return ((n + m - 1) // m) * m


def _choose_tile(batch, tile_m):
    """Pick a batch-tile width: multiple of 128, VMEM-safe, grid >= 2 if possible."""
    tile_m = max(128, min(int(tile_m), _TILE_M_MAX))
    tile_m = (tile_m // 128) * 128
    b128 = _round_up(batch, 128)
    # Keep at least 2 grid steps when the batch allows it so the "parallel"
    # batch axis can shard across both TensorCores on v7x.
    cap = max(128, ((b128 // 2) // 128) * 128)
    return min(tile_m, cap)


# ---------------------------------------------------------------------------
# Native (feature-major, zero-wrapper-transpose) entry point
# ---------------------------------------------------------------------------
def mlp_forward_feature_major(xt, params, tile_m=TILE_M_DEFAULT):
    """xt: (in_dim, batch) bf16.  Returns (out_dim, batch) bf16.

    This is the zero-copy path: no wrapper-side transposes at all.  Callers
    that can keep activations feature-major should use this directly.
    """
    in_dim, batch = xt.shape
    out_dim = params[-1][0].shape[0]

    tile = _choose_tile(batch, tile_m)
    padded = _round_up(batch, tile)
    if padded != batch:
        xt = jnp.pad(xt, ((0, 0), (0, padded - batch)))
    grid = (padded // tile,)

    flat_args = [xt]
    in_specs = [pl.BlockSpec((in_dim, tile), lambda i: (0, i))]
    for (w, b) in params:
        flat_args += [w, b]
        # Whole-array blocks + constant index_map: weights/biases are DMA'd
        # once and stay resident in VMEM across all batch tiles.
        in_specs += [pl.BlockSpec(w.shape, lambda i: (0, 0)),
                     pl.BlockSpec(b.shape, lambda i: (0, 0))]

    # VMEM per tile (tile=8192): x 2*256 KiB + out 2*128 KiB + ~4 MiB of
    # (32, T) f32 intermediates + ~5 KiB weights -> well under every
    # generation's scoped default, so no vmem_limit_bytes bump is needed.
    out_t = pl.pallas_call(
        _mlp_kernel,
        out_shape=jax.ShapeDtypeStruct((out_dim, padded), jnp.bfloat16),
        grid=grid,
        in_specs=in_specs,
        out_specs=pl.BlockSpec((out_dim, tile), lambda i: (0, i)),
        compiler_params=pltpu.CompilerParams(
            dimension_semantics=("parallel",)),   # batch tiles are independent
    )(*flat_args)

    # Padded columns contain garbage (bias+ReLU chain); slice before returning.
    return out_t[:, :batch]


# ---------------------------------------------------------------------------
# Plain-XLA path (small-batch fallback AND the numerics reference)
# ---------------------------------------------------------------------------
def _mlp_xla(x, params):
    """Plain-JAX path with the same bf16-matmul / f32-accumulate / bf16-out numerics."""
    h = x.T.astype(jnp.bfloat16)
    for i, (w, b) in enumerate(params):
        h = jnp.dot(w, h.astype(jnp.bfloat16),
                    preferred_element_type=jnp.float32) + b
        if i < len(params) - 1:
            h = jnp.maximum(h, 0.0)
    return h.astype(jnp.bfloat16).T


# ---------------------------------------------------------------------------
# PyTorch-layout wrapper: (batch, in) f32 -> (batch, out) bf16
# ---------------------------------------------------------------------------
@functools.partial(jax.jit, static_argnames=("tile_m", "force_pallas"))
def mlp_forward(x, params, tile_m=TILE_M_DEFAULT, force_pallas=False):
    """x: (batch, in_dim) f32.  params: list of (W, b); W (out, in) bf16, b (out, 1) f32."""
    batch, _ = x.shape
    # pallas_call fixed cost + the layout pass dominate at serving-size
    # batches; route those through plain XLA (the kernel wins on big batches).
    if not force_pallas and batch < _XLA_FALLBACK_ROWS:
        return _mlp_xla(x, params)

    # Single fused pad/cast/transpose pass into the kernel's native layout.
    xt = x.T.astype(jnp.bfloat16)                       # (in_dim, batch) bf16
    out_t = mlp_forward_feature_major(xt, params, tile_m=tile_m)
    # Transpose-back operates on bf16 (half the bytes of the old f32 path).
    return out_t.T                                      # (batch, out_dim) bf16


# ---------------------------------------------------------------------------
# Parameter init (matches torch.nn.Linear defaults, (out, in) layout)
# ---------------------------------------------------------------------------
def init_linear(key, fan_in, fan_out):
    kw, kb = jax.random.split(key)
    bound = 1.0 / jnp.sqrt(float(fan_in))
    w = jax.random.uniform(kw, (fan_out, fan_in), jnp.float32, -bound, bound)
    b = jax.random.uniform(kb, (fan_out, 1), jnp.float32, -bound, bound)
    return w.astype(jnp.bfloat16), b


if __name__ == "__main__":
    # Module hyperparameters (all hidden sizes nonzero -> full 5-linear path).
    input_size, hs1, hs2, hs3, hs4, output_size = 16, 32, 32, 32, 32, 8
    batch = 300   # small; not a multiple of 128 -> exercises the padded tail tile

    key = jax.random.PRNGKey(0)
    keys = jax.random.split(key, 6)

    params = [
        init_linear(keys[0], input_size, hs1),   # IL
        init_linear(keys[1], hs1, hs2),          # HL2
        init_linear(keys[2], hs2, hs3),          # HL3
        init_linear(keys[3], hs3, hs4),          # HL4
        init_linear(keys[4], hs4, output_size),  # FL
    ]

    x = jax.random.normal(keys[5], (batch, input_size), jnp.float32)

    # Force the Pallas path (small batches normally dispatch to plain XLA).
    out = mlp_forward(x, params, force_pallas=True)
    out = jax.block_until_ready(out)

    ref = _mlp_xla(x, params)
    assert out.shape == (batch, output_size)
    assert out.dtype == jnp.bfloat16
    err = float(jnp.max(jnp.abs(out.astype(jnp.float32) - ref.astype(jnp.float32))))
    assert err <= 5e-2, err

    print("KERNEL_OK")
</pallas_src>

<mosaic_0001>
module attributes {stable_mosaic.version = 11 : i64} {
  func.func @_mlp_kernel(%arg0: i32, %arg1: memref<16x128xbf16, #tpu.memory_space<vmem>>, %arg2: memref<32x16xbf16, #tpu.memory_space<vmem>>, %arg3: memref<32x1xf32, #tpu.memory_space<vmem>>, %arg4: memref<32x32xbf16, #tpu.memory_space<vmem>>, %arg5: memref<32x1xf32, #tpu.memory_space<vmem>>, %arg6: memref<32x32xbf16, #tpu.memory_space<vmem>>, %arg7: memref<32x1xf32, #tpu.memory_space<vmem>>, %arg8: memref<32x32xbf16, #tpu.memory_space<vmem>>, %arg9: memref<32x1xf32, #tpu.memory_space<vmem>>, %arg10: memref<8x32xbf16, #tpu.memory_space<vmem>>, %arg11: memref<8x1xf32, #tpu.memory_space<vmem>>, %arg12: memref<8x128xbf16, #tpu.memory_space<vmem>>) attributes {dimension_semantics = [#tpu.dimension_semantics<parallel>], iteration_bounds = array<i64: 3>, scalar_prefetch = 0 : i64, scratch_operands = 0 : i64, tpu.core_type = #tpu.core_type<tc>, window_params = [{transform_indices = @transform_0, window_bounds = array<i64: 16, 128>}, {pipeline_mode = #tpu.pipeline_mode<synchronous>, transform_indices = @transform_1, window_bounds = array<i64: 32, 16>}, {pipeline_mode = #tpu.pipeline_mode<synchronous>, transform_indices = @transform_2, window_bounds = array<i64: 32, 1>}, {pipeline_mode = #tpu.pipeline_mode<synchronous>, transform_indices = @transform_3, window_bounds = array<i64: 32, 32>}, {pipeline_mode = #tpu.pipeline_mode<synchronous>, transform_indices = @transform_4, window_bounds = array<i64: 32, 1>}, {pipeline_mode = #tpu.pipeline_mode<synchronous>, transform_indices = @transform_5, window_bounds = array<i64: 32, 32>}, {pipeline_mode = #tpu.pipeline_mode<synchronous>, transform_indices = @transform_6, window_bounds = array<i64: 32, 1>}, {pipeline_mode = #tpu.pipeline_mode<synchronous>, transform_indices = @transform_7, window_bounds = array<i64: 32, 32>}, {pipeline_mode = #tpu.pipeline_mode<synchronous>, transform_indices = @transform_8, window_bounds = array<i64: 32, 1>}, {pipeline_mode = #tpu.pipeline_mode<synchronous>, transform_indices = @transform_9, window_bounds = array<i64: 8, 32>}, {pipeline_mode = #tpu.pipeline_mode<synchronous>, transform_indices = @transform_10, window_bounds = array<i64: 8, 1>}, {transform_indices = @transform_11, window_bounds = array<i64: 8, 128>}]} {
    %c0 = arith.constant 0 : index
    %c0_0 = arith.constant 0 : index
    %0 = vector.load %arg2[%c0, %c0_0] : memref<32x16xbf16, #tpu.memory_space<vmem>>, vector<32x16xbf16>
    %c0_1 = arith.constant 0 : index
    %c0_2 = arith.constant 0 : index
    %1 = vector.load %arg1[%c0_1, %c0_2] : memref<16x128xbf16, #tpu.memory_space<vmem>>, vector<16x128xbf16>
    %cst = arith.constant dense<0.000000e+00> : vector<32x128xf32>
    %2 = tpu.matmul %0, %1, %cst {dimension_numbers = #tpu.dot_dimension_numbers<[1], [0], [0], [1], [0, 0, 1, 1], [], []>} : vector<32x16xbf16>, vector<16x128xbf16>, vector<32x128xf32> -> vector<32x128xf32>
    %c0_3 = arith.constant 0 : index
    %c0_4 = arith.constant 0 : index
    %3 = vector.load %arg3[%c0_3, %c0_4] : memref<32x1xf32, #tpu.memory_space<vmem>>, vector<32x1xf32>
    %4 = vector.broadcast %3 : vector<32x1xf32> to vector<32x128xf32>
    %5 = arith.addf %2, %4 : vector<32x128xf32>
    %cst_5 = arith.constant 0.000000e+00 : f32
    %6 = vector.broadcast %cst_5 : f32 to vector<32x128xf32>
    %7 = arith.maximumf %5, %6 : vector<32x128xf32>
    %c0_6 = arith.constant 0 : index
    %c0_7 = arith.constant 0 : index
    %8 = vector.load %arg4[%c0_6, %c0_7] : memref<32x32xbf16, #tpu.memory_space<vmem>>, vector<32x32xbf16>
    %9 = arith.truncf %7 : vector<32x128xf32> to vector<32x128xbf16>
    %cst_8 = arith.constant dense<0.000000e+00> : vector<32x128xf32>
    %10 = tpu.matmul %8, %9, %cst_8 {dimension_numbers = #tpu.dot_dimension_numbers<[1], [0], [0], [1], [0, 0, 1, 1], [], []>} : vector<32x32xbf16>, vector<32x128xbf16>, vector<32x128xf32> -> vector<32x128xf32>
    %c0_9 = arith.constant 0 : index
    %c0_10 = arith.constant 0 : index
    %11 = vector.load %arg5[%c0_9, %c0_10] : memref<32x1xf32, #tpu.memory_space<vmem>>, vector<32x1xf32>
    %12 = vector.broadcast %11 : vector<32x1xf32> to vector<32x128xf32>
    %13 = arith.addf %10, %12 : vector<32x128xf32>
    %cst_11 = arith.constant 0.000000e+00 : f32
    %14 = vector.broadcast %cst_11 : f32 to vector<32x128xf32>
    %15 = arith.maximumf %13, %14 : vector<32x128xf32>
    %c0_12 = arith.constant 0 : index
    %c0_13 = arith.constant 0 : index
    %16 = vector.load %arg6[%c0_12, %c0_13] : memref<32x32xbf16, #tpu.memory_space<vmem>>, vector<32x32xbf16>
    %17 = arith.truncf %15 : vector<32x128xf32> to vector<32x128xbf16>
    %cst_14 = arith.constant dense<0.000000e+00> : vector<32x128xf32>
    %18 = tpu.matmul %16, %17, %cst_14 {dimension_numbers = #tpu.dot_dimension_numbers<[1], [0], [0], [1], [0, 0, 1, 1], [], []>} : vector<32x32xbf16>, vector<32x128xbf16>, vector<32x128xf32> -> vector<32x128xf32>
    %c0_15 = arith.constant 0 : index
    %c0_16 = arith.constant 0 : index
    %19 = vector.load %arg7[%c0_15, %c0_16] : memref<32x1xf32, #tpu.memory_space<vmem>>, vector<32x1xf32>
    %20 = vector.broadcast %19 : vector<32x1xf32> to vector<32x128xf32>
    %21 = arith.addf %18, %20 : vector<32x128xf32>
    %cst_17 = arith.constant 0.000000e+00 : f32
    %22 = vector.broadcast %cst_17 : f32 to vector<32x128xf32>
    %23 = arith.maximumf %21, %22 : vector<32x128xf32>
    %c0_18 = arith.constant 0 : index
    %c0_19 = arith.constant 0 : index
    %24 = vector.load %arg8[%c0_18, %c0_19] : memref<32x32xbf16, #tpu.memory_space<vmem>>, vector<32x32xbf16>
    %25 = arith.truncf %23 : vector<32x128xf32> to vector<32x128xbf16>
    %cst_20 = arith.constant dense<0.000000e+00> : vector<32x128xf32>
    %26 = tpu.matmul %24, %25, %cst_20 {dimension_numbers = #tpu.dot_dimension_numbers<[1], [0], [0], [1], [0, 0, 1, 1], [], []>} : vector<32x32xbf16>, vector<32x128xbf16>, vector<32x128xf32> -> vector<32x128xf32>
    %c0_21 = arith.constant 0 : index
    %c0_22 = arith.constant 0 : index
    %27 = vector.load %arg9[%c0_21, %c0_22] : memref<32x1xf32, #tpu.memory_space<vmem>>, vector<32x1xf32>
    %28 = vector.broadcast %27 : vector<32x1xf32> to vector<32x128xf32>
    %29 = arith.addf %26, %28 : vector<32x128xf32>
    %cst_23 = arith.constant 0.000000e+00 : f32
    %30 = vector.broadcast %cst_23 : f32 to vector<32x128xf32>
    %31 = arith.maximumf %29, %30 : vector<32x128xf32>
    %c0_24 = arith.constant 0 : index
    %c0_25 = arith.constant 0 : index
    %32 = vector.load %arg10[%c0_24, %c0_25] : memref<8x32xbf16, #tpu.memory_space<vmem>>, vector<8x32xbf16>
    %33 = arith.truncf %31 : vector<32x128xf32> to vector<32x128xbf16>
    %cst_26 = arith.constant dense<0.000000e+00> : vector<8x128xf32>
    %34 = tpu.matmul %32, %33, %cst_26 {dimension_numbers = #tpu.dot_dimension_numbers<[1], [0], [0], [1], [0, 0, 1, 1], [], []>} : vector<8x32xbf16>, vector<32x128xbf16>, vector<8x128xf32> -> vector<8x128xf32>
    %c0_27 = arith.constant 0 : index
    %c0_28 = arith.constant 0 : index
    %35 = vector.load %arg11[%c0_27, %c0_28] : memref<8x1xf32, #tpu.memory_space<vmem>>, vector<8x1xf32>
    %36 = vector.broadcast %35 : vector<8x1xf32> to vector<8x128xf32>
    %37 = arith.addf %34, %36 : vector<8x128xf32>
    %38 = arith.truncf %37 : vector<8x128xf32> to vector<8x128xbf16>
    %c0_29 = arith.constant 0 : index
    %c0_30 = arith.constant 0 : index
    %39 = vector.load %arg12[%c0_29, %c0_30] : memref<8x128xbf16, #tpu.memory_space<vmem>>, vector<8x128xbf16>
    tpu.vector_store %arg12[%c0_29, %c0_30], %38 {strides = array<i32>} : memref<8x128xbf16, #tpu.memory_space<vmem>>, vector<8x128xbf16>,
    return
  }
  func.func @transform_0(%arg0: i32) -> (i32, i32) {
    %c0_i32 = arith.constant 0 : i32
    %c0_i32_0 = arith.constant 0 : i32
    return %c0_i32, %arg0 : i32, i32
  }
  func.func @transform_1(%arg0: i32) -> (i32, i32) {
    %c0_i32 = arith.constant 0 : i32
    %c0_i32_0 = arith.constant 0 : i32
    %c0_i32_1 = arith.constant 0 : i32
    return %c0_i32, %c0_i32_0 : i32, i32
  }
  func.func @transform_2(%arg0: i32) -> (i32, i32) {
    %c0_i32 = arith.constant 0 : i32
    %c0_i32_0 = arith.constant 0 : i32
    %c0_i32_1 = arith.constant 0 : i32
    return %c0_i32, %c0_i32_0 : i32, i32
  }
  func.func @transform_3(%arg0: i32) -> (i32, i32) {
    %c0_i32 = arith.constant 0 : i32
    %c0_i32_0 = arith.constant 0 : i32
    %c0_i32_1 = arith.constant 0 : i32
    return %c0_i32, %c0_i32_0 : i32, i32
  }
  func.func @transform_4(%arg0: i32) -> (i32, i32) {
    %c0_i32 = arith.constant 0 : i32
    %c0_i32_0 = arith.constant 0 : i32
    %c0_i32_1 = arith.constant 0 : i32
    return %c0_i32, %c0_i32_0 : i32, i32
  }
  func.func @transform_5(%arg0: i32) -> (i32, i32) {
    %c0_i32 = arith.constant 0 : i32
    %c0_i32_0 = arith.constant 0 : i32
    %c0_i32_1 = arith.constant 0 : i32
    return %c0_i32, %c0_i32_0 : i32, i32
  }
  func.func @transform_6(%arg0: i32) -> (i32, i32) {
    %c0_i32 = arith.constant 0 : i32
    %c0_i32_0 = arith.constant 0 : i32
    %c0_i32_1 = arith.constant 0 : i32
    return %c0_i32, %c0_i32_0 : i32, i32
  }
  func.func @transform_7(%arg0: i32) -> (i32, i32) {
    %c0_i32 = arith.constant 0 : i32
    %c0_i32_0 = arith.constant 0 : i32
    %c0_i32_1 = arith.constant 0 : i32
    return %c0_i32, %c0_i32_0 : i32, i32
  }
  func.func @transform_8(%arg0: i32) -> (i32, i32) {
    %c0_i32 = arith.constant 0 : i32
    %c0_i32_0 = arith.constant 0 : i32
    %c0_i32_1 = arith.constant 0 : i32
    return %c0_i32, %c0_i32_0 : i32, i32
  }
  func.func @transform_9(%arg0: i32) -> (i32, i32) {
    %c0_i32 = arith.constant 0 : i32
    %c0_i32_0 = arith.constant 0 : i32
    %c0_i32_1 = arith.constant 0 : i32
    return %c0_i32, %c0_i32_0 : i32, i32
  }
  func.func @transform_10(%arg0: i32) -> (i32, i32) {
    %c0_i32 = arith.constant 0 : i32
    %c0_i32_0 = arith.constant 0 : i32
    %c0_i32_1 = arith.constant 0 : i32
    return %c0_i32, %c0_i32_0 : i32, i32
  }
  func.func @transform_11(%arg0: i32) -> (i32, i32) {
    %c0_i32 = arith.constant 0 : i32
    %c0_i32_0 = arith.constant 0 : i32
    return %c0_i32, %arg0 : i32, i32
  }
}

</mosaic_0001>

<bundles_post_ra>
// kernel: mlp_forward.1
= control target key start
LH: loop header
LB: loop body
LE: loop exit
PB: predicated region body
PF: predicated region fallthrough
CT: control target
= control target key end

     0   :  { %s981_s17 = smov 0   ;;  %s983_s18 = smov 0   ;;  %s1120_s0 = inlined_call_operand.vmem [shape: bf16[16,384], index: 0, kind: input, shape index: {}]   ;;  %s1121_s1 = inlined_call_operand.vmem [shape: bf16[32,16], index: 1, kind: input, shape index: {}]   ;;  %s1122_s2 = inlined_call_operand.vmem [shape: f32[32,1], index: 2, kind: input, shape index: {}]   ;;  %s1123_s3 = inlined_call_operand.vmem [shape: bf16[32,32], index: 3, kind: input, shape index: {}]   ;;  %s1124_s4 = inlined_call_operand.vmem [shape: f32[32,1], index: 4, kind: input, shape index: {}]   ;;  %s1125_s5 = inlined_call_operand.vmem [shape: bf16[32,32], index: 5, kind: input, shape index: {}]   ;;  %s1126_s6 = inlined_call_operand.vmem [shape: f32[32,1], index: 6, kind: input, shape index: {}]   ;;  %s1127_s7 = inlined_call_operand.vmem [shape: bf16[32,32], index: 7, kind: input, shape index: {}]   ;;  %s1128_s8 = inlined_call_operand.vmem [shape: f32[32,1], index: 8, kind: input, shape index: {}]   ;;  %s1129_s9 = inlined_call_operand.vmem [shape: bf16[8,32], index: 9, kind: input, shape index: {}]   ;;  %s1130_s10 = inlined_call_operand.vmem [shape: f32[8,1], index: 10, kind: input, shape index: {}]   ;;  %s1131_s11 = inlined_call_operand.vmem [shape: bf16[8,384], index: 11, kind: output, shape index: {}]  }
   0x1   :  { %s985_s19 = smov 0  }
   0x2 LB: > { %s803_s20 = sadd.s32 4294967295, %s918_s19   ;;  %s998_s21 = sadd.s32 1, %s918_s19   ;;  %s918_s19 = sphi %s985_s19, %s1134_s19   ;;  %s914_s18 = sphi %s983_s18, %s1133_s18   ;;  %s910_s17 = sphi %s981_s17, %s1132_s17  }
   0x3   : > { %s25_s22 = ssub.s32 %s918_s19, %s998_s21  ;;  %s28_s23 = sadd.s32 1, %s914_s18 }
   0x4   : > { %p26_p0 = scmp.eq.s32.totalorder %s25_s22, 0  ;;  %p35_p1 = scmp.ne.s32.totalorder %s914_s18, %s910_s17 }
   0x5   : > { %p36_p2 = scmp.eq.s32.totalorder %s918_s19, 0  ;;  %p806_p4 = scmp.ge.s32.totalorder %s918_s19, 3 }
   0x6   : > { %s1007_s24 = scalar_select %p26_p0, %s914_s18, %s28_s23  }
   0x7   : > { %p37_p3 = por %p36_p2, %p35_p1  ;;  %327 = sbr.rel (%p806_p4) target bundleno = 18 (0x12), region = 56 }
   0xc   : > { %330 = sbr.rel (!%p37_p3) target bundleno = 18 (0x12), region = 60  ;;  %s332_s25 = sand.u32 (%p37_p3), 1, %s914_s18  }
   0xd   : > { %s808_s26 = sshll.u32 (%p37_p3), %s918_s19, 2  ;;  %s807_s27 = sshll.u32 (%p37_p3), %s332_s25, 3 }
   0xe   : > { %s336_s30 = scalar_lea.vmem (%p37_p3), %s1120_s0, %s808_s26  ;;  %s334_s12 = scalar_lea.vmem (%p37_p3), [#allocation2], %s807_s27 }
   0xf   : > { %v353_v0 = vld [vmem:[%s336_s30] sm:$0xf] (%p37_p3)  ;;  %v355_v1 = vld [vmem:[%s336_s30 + $0xc] sm:$0xf] (%p37_p3) }
  0x10   : > { %354 = vst [vmem:[%s334_s12] sm:$0xf] (%p37_p3), %v353_v0 }
  0x11   : > { %356 = vst [vmem:[%s334_s12 + $0x4] sm:$0xf] %v355_v1 }
  0x12 PF: > { %p809_p5 = scmp.ge.s32.totalorder %s918_s19, 1  ;;  %p383_p6 = scmp.lt.s32.totalorder %s918_s19, 4 }
  0x14   : > { %p384_p7 = pnand %p809_p5, %p383_p6 }
  0x15   : > { %s390_s22 = sand.u32 (!%p384_p7), 1, %s910_s17   ;;  %p428_p8 = scmp.lt.s32.totalorder (!%p384_p7), %s803_s20, 2 }
  0x16   : > { %387 = sbr.rel (%p384_p7) target bundleno = 831 (0x33f), region = 101  ;;  %s810_s23 = sshll.u32 (!%p384_p7), %s390_s22, 3 }
  0x17   : > { %s392_s25 = scalar_lea.vmem (!%p384_p7), [#allocation2], %s810_s23 }
  0x1b   : > { %v441_v2 = vld [vmem:[%s1122_s2 + $0x10] sm:$0xff]  ;;  %v439_v3 = vld [vmem:[%s1122_s2] sm:$0xff]  ;;  %v920_v4 = vmov 0   ;;  %vm479_vm0 = vcmask 130048   ;;  %v442_v7 = vld [vmem:[%s1122_s2 + $0x18] sm:$0xff]  ;;  %vm549_vm1 = vcmask 261120  }
  0x1c   : > { %894 = vset.pattern.permute.xlu1 %v920_v4  ;;  %893 = vset.pattern.permute.xlu0 %v920_v4  ;;  %v861_v5 = vld [vmem:[%s392_s25] sm:$0xff]  ;;  %v588_v12 = vld [vmem:[%s1126_s6 + $0x18] sm:$0xff]  ;;  %v656_v14 = vld [vmem:[%s1128_s8 + $0x10] sm:$0xff]  ;;  %s1136_s20 = smov (!%p428_p8, %s803_s20), 2 }
  0x1d   : > { %455 = vperm.xlu0 %893, %v441_v2   ;;  %445 = vperm.xlu1 %894, %v439_v3   ;;  %v859_v6 = vld [vmem:[%s1121_s1] sm:$0xff]  ;;  %v440_v8 = vld [vmem:[%s1122_s2 + $0x8] sm:$0xff]  ;;  %v657_v15 = vld [vmem:[%s1128_s8 + $0x18] sm:$0xff]  ;;  %s811_s12 = sshll.u32 %s1136_s20, 2 }
  0x1e   : > { %895 = vset.pattern.permute.xlu2 %v920_v4  ;;  %493 = vmatpush.bf16.msra.mxu0 %v861_v5  ;;  %v515_v9 = vld [vmem:[%s1124_s4] sm:$0xff]  ;;  %v516_v10 = vld [vmem:[%s1124_s4 + $0x8] sm:$0xff]  ;;  %v517_v23 = vld [vmem:[%s1124_s4 + $0x10] sm:$0xff]  ;;  %s431_s15 = scalar_lea.vmem %s1131_s11, %s811_s12 }
  0x1f   : > { %v860_v11 = vld [vmem:[%s1121_s1 + $0x8] sm:$0xff]  ;;  %v585_v13 = vld [vmem:[%s1126_s6] sm:$0xff]  ;;  %531 = vperm.xlu2 %895, %v517_v23   ;;  %v518_v33 = vld [vmem:[%s1124_s4 + $0x18] sm:$0xff] }
  0x20   : > { %v655_v16 = vld [vmem:[%s1128_s8 + $0x8] sm:$0xff]  ;;  %v720_v17 = vld [vmem:[%s1130_s10] sm:$0xff]  ;;  %v587_v39 = vld [vmem:[%s1126_s6 + $0x10] sm:$0xff] }
  0x21   : > { %824 = vmatmul.msk.bf16.vlgmr.msra.gmra.mxu0 %vm479_vm0, %v859_v6  ;;  %v862_v38 = vld [vmem:[%s1123_s3] sm:$0xff]  ;;  %v586_v40 = vld [vmem:[%s1126_s6 + $0x8] sm:$0xff] }
  0x22   : > { %v863_v41 = vld [vmem:[%s1123_s3 + $0x8] sm:$0xff]  ;;  %v654_v42 = vld [vmem:[%s1128_s8] sm:$0xff] }
  0x23   : > { %v864_v61 = vld [vmem:[%s1125_s5] sm:$0xff]  ;;  %v865_v62 = vld [vmem:[%s1125_s5 + $0x8] sm:$0xff] }
  0x25   : > { %460 = vperm.xlu0 %893, %v442_v7   ;;  %450 = vperm.xlu1 %894, %v440_v8  }
  0x27   : > { %536 = vperm.xlu2 %895, %v518_v33  }
  0x2d   : > { %521 = vperm.xlu0 %893, %v515_v9   ;;  %526 = vperm.xlu1 %894, %v516_v10  }
  0x2f   : > { %601 = vperm.xlu2 %895, %v587_v39  }
  0x31   : > { %825 = vmatmul.msk.bf16.gmra.mxu0 %vm479_vm0, %v860_v11 }
  0x35   : > { %606 = vperm.xlu0 %893, %v588_v12   ;;  %591 = vperm.xlu1 %894, %v585_v13  }
  0x37   : > { %596 = vperm.xlu2 %895, %v586_v40  }
  0x3d   : > { %670 = vperm.xlu0 %893, %v656_v14   ;;  %675 = vperm.xlu1 %894, %v657_v15  }
  0x3f   : > { %660 = vperm.xlu2 %895, %v654_v42  }
  0x45   : > { %665 = vperm.xlu0 %893, %v655_v16   ;;  %723 = vperm.xlu1 %894, %v720_v17   ;;  %v866_v17 = vld [vmem:[%s1127_s7] sm:$0xff] }
  0x79   : > { %v532_v45 = vpop.permute.xlu2 %531 }
  0x81   : > { %v537_v49 = vpop.permute.xlu2 %536 }
  0x89   : > { %v602_v1 = vpop.permute.xlu2 %601 }
  0x8f   : > { %v456_v20 = vpop.permute.xlu0 %455  ;;  %v446_v21 = vpop.permute.xlu1 %445 }
  0x91   : > { %v597_v5 = vpop.permute.xlu2 %596 }
  0x97   : > { %v461_v24 = vpop.permute.xlu0 %460  ;;  %v451_v26 = vpop.permute.xlu1 %450 }
  0x9e   : > { %v495_v18 = vpop.f32.mrf.mxu0 }
  0x9f   : > { %v496_v30 = vadd.f32 %v495_v18, %v446_v21  ;;  %v527_v47 = vpop.permute.xlu1 %526  ;;  %v522_v53 = vpop.permute.xlu0 %521  ;;  %v867_v18 = vld [vmem:[%s1127_s7 + $0x8] sm:$0xff] }
  0xa1   : > { %v505_v36 = vmax.f32 %v496_v30, 0.0 }
  0xa6   : > { %v497_v19 = vpop.f32.mrf.mxu0 }
  0xa7   : > { %v498_v28 = vadd.f32 %v497_v19, %v451_v26  ;;  %v607_v3 = vpop.permute.xlu0 %606  ;;  %v592_v9 = vpop.permute.xlu1 %591 }
  0xa9   : > { %v506_v34 = vmax.f32 %v498_v28, 0.0 }
  0xab   : > { %v513_v37 = vpack.c.bf16 %v506_v34, %v505_v36 }
  0xae   : > { %v500_v22 = vpop.f32.mrf.mxu0 }
  0xaf   : > { %v501_v25 = vadd.f32 %v500_v22, %v456_v20  ;;  %v671_v21 = vpop.permute.xlu0 %670  ;;  %v676_v23 = vpop.permute.xlu1 %675 }
  0xb1   : > { %v507_v31 = vmax.f32 %v501_v25, 0.0 }
  0xb6   : > { %v502_v27 = vpop.f32.mrf.mxu0 }
  0xb7   : > { %v503_v29 = vadd.f32 %v502_v27, %v461_v24  ;;  %v666_v25 = vpop.permute.xlu0 %665 }
  0xb9   : > { %v508_v32 = vmax.f32 %v503_v29, 0.0  ;;  %v661_v29 = vpop.permute.xlu2 %660 }
  0xbb   : > { %v514_v35 = vpack.c.bf16 %v508_v32, %v507_v31 }
  0xbd   : > { %562 = vmatpush.bf16.msra.mxu1 %v514_v35 }
  0xc1   : > { %563 = vmatpush.bf16.msra.mxu1 %v513_v37  ;;  %v717_v37 = vld [vmem:[%s1129_s9] sm:$0xf] }
  0xc4   : > { %834 = vmatmul.msk.bf16.vlgmr.msra.gmra.mxu1 %vm549_vm1, %v862_v38  ;;  %v724_v38 = vpop.permute.xlu1 %723 }
  0xd4   : > { %835 = vmatmul.msk.bf16.gmra.mxu1 %vm549_vm1, %v863_v41 }
 0x141   : > { %v565_v43 = vpop.f32.mrf.mxu1 }
 0x142   : > { %v566_v54 = vadd.f32 %v565_v43, %v522_v53 }
 0x144   : > { %v575_v59 = vmax.f32 %v566_v54, 0.0 }
 0x149   : > { %v567_v44 = vpop.f32.mrf.mxu1 }
 0x14a   : > { %v568_v51 = vadd.f32 %v567_v44, %v527_v47 }
 0x14c   : > { %v576_v57 = vmax.f32 %v568_v51, 0.0 }
 0x14e   : > { %v583_v60 = vpack.c.bf16 %v576_v57, %v575_v59 }
 0x151   : > { %v570_v46 = vpop.f32.mrf.mxu1 }
 0x152   : > { %v571_v48 = vadd.f32 %v570_v46, %v532_v45 }
 0x154   : > { %v577_v55 = vmax.f32 %v571_v48, 0.0 }
 0x159   : > { %v572_v50 = vpop.f32.mrf.mxu1 }
 0x15a   : > { %v573_v52 = vadd.f32 %v572_v50, %v537_v49 }
 0x15c   : > { %v578_v56 = vmax.f32 %v573_v52, 0.0 }
 0x15e   : > { %v584_v58 = vpack.c.bf16 %v578_v56, %v577_v55 }
 0x160   : > { %631 = vmatpush.bf16.msra.mxu2 %v584_v58 }
 0x164   : > { %632 = vmatpush.bf16.msra.mxu2 %v583_v60 }
 0x167   : > { %844 = vmatmul.msk.bf16.vlgmr.msra.gmra.mxu2 %vm549_vm1, %v864_v61 }
 0x177   : > { %845 = vmatmul.msk.bf16.gmra.mxu2 %vm549_vm1, %v865_v62 }
 0x1ea   : > { %v634_v63 = vpop.f32.mrf.mxu2 }
 0x1eb   : > { %v635_v10 = vadd.f32 %v634_v63, %v592_v9 }
 0x1ed   : > { %v644_v15 = vmax.f32 %v635_v10, 0.0 }
 0x1f2   : > { %v636_v0 = vpop.f32.mrf.mxu2 }
 0x1f3   : > { %v637_v7 = vadd.f32 %v636_v0, %v597_v5 }
 0x1f5   : > { %v645_v13 = vmax.f32 %v637_v7, 0.0 }
 0x1f7   : > { %v652_v16 = vpack.c.bf16 %v645_v13, %v644_v15 }
 0x1fa   : > { %v639_v2 = vpop.f32.mrf.mxu2 }
 0x1fb   : > { %v640_v4 = vadd.f32 %v639_v2, %v602_v1 }
 0x1fd   : > { %v646_v11 = vmax.f32 %v640_v4, 0.0 }
 0x202   : > { %v641_v6 = vpop.f32.mrf.mxu2 }
 0x203   : > { %v642_v8 = vadd.f32 %v641_v6, %v607_v3 }
 0x205   : > { %v647_v12 = vmax.f32 %v642_v8, 0.0 }
 0x207   : > { %v653_v14 = vpack.c.bf16 %v647_v12, %v646_v11 }
 0x209   : > { %700 = vmatpush.bf16.msra.mxu3 %v653_v14 }
 0x20d   : > { %701 = vmatpush.bf16.msra.mxu3 %v652_v16 }
 0x210   : > { %854 = vmatmul.msk.bf16.vlgmr.msra.gmra.mxu3 %vm549_vm1, %v866_v17 }
 0x220   : > { %855 = vmatmul.msk.bf16.gmra.mxu3 %vm549_vm1, %v867_v18 }
 0x293   : > { %v703_v19 = vpop.f32.mrf.mxu3 }
 0x294   : > { %v704_v30 = vadd.f32 %v703_v19, %v661_v29 }
 0x296   : > { %v713_v35 = vmax.f32 %v704_v30, 0.0 }
 0x29b   : > { %v705_v20 = vpop.f32.mrf.mxu3 }
 0x29c   : > { %v706_v27 = vadd.f32 %v705_v20, %v666_v25 }
 0x29e   : > { %v714_v33 = vmax.f32 %v706_v27, 0.0 }
 0x2a0   : > { %v718_v36 = vpack.c.bf16 %v714_v33, %v713_v35 }
 0x2a3   : > { %v708_v22 = vpop.f32.mrf.mxu3 }
 0x2a4   : > { %v709_v24 = vadd.f32 %v708_v22, %v671_v21 }
 0x2a6   : > { %v715_v31 = vmax.f32 %v709_v24, 0.0 }
 0x2ab   : > { %v710_v26 = vpop.f32.mrf.mxu3 }
 0x2ac   : > { %v711_v28 = vadd.f32 %v710_v26, %v676_v23 }
 0x2ae   : > { %v716_v32 = vmax.f32 %v711_v28, 0.0 }
 0x2b0   : > { %v719_v34 = vpack.c.bf16 %v716_v32, %v715_v31 }
 0x2b2   : > { %735 = vmatpush.bf16.msrb.mxu0 %v719_v34 }
 0x2b6   : > { %736 = vmatpush.bf16.msrb.mxu0 %v718_v36 }
 0x2b9   : > { %856 = vmatmul.msk.bf16.vlgmr.msrb.gmra.mxu0 %vm549_vm1, %v717_v37 }
 0x336   : > { %v738_v39 = vpop.f32.mrf.mxu0 }
 0x337   : > { %v739_v40 = vadd.f32 %v738_v39, %v724_v38 }
 0x339   : > { %v742_v41 = vpack.c.bf16 %v739_v40, %v739_v40 }
 0x33b   : > { %743 = vst [vmem:[%s431_s15] sm:$0xf] %v742_v41 }
 0x33e   : > { %v740_v42 = vpop.f32.mrf.mxu0 }
 0x33f PF: > { %p18_p9 = scmp.ge.s32.totalorder %s998_s21, 5   ;;  %s1132_s17 = smov %s914_s18 }
 0x340   : > { %s1133_s18 = smov %s1007_s24  ;;  %s1134_s19 = smov %s998_s21 }
 0x341   :  { %20 = sbr.rel (!%p18_p9) target bundleno = 2 (0x2), region = 140 }

</bundles_post_ra>
